<compile_context>
chip_gen: v5e
topology: v5e:2x2
jax: 0.10.0
libtpu: 0.0.40
codegen_flags: <defaults>
</compile_context>

<pallas_src>
import functools

import jax
import jax.numpy as jnp
from jax.experimental import pallas as pl
from jax.experimental.pallas import tpu as pltpu

_NEG_FILL = -1e9  # bias fill for padded action lanes (large-negative, not -inf)


def _categorical_net_kernel(x_ref, wt_ref, b_ref, logp_ref, stats_ref):
    # x_ref:  [tb, D]     native dtype (bf16 stays bf16; MXU accumulates in f32)
    # wt_ref: [D, A_pad]  pre-transposed, lane-major RHS (no in-kernel transpose)
    # b_ref:  [1, A_pad]  f32 bias, padded lanes filled with _NEG_FILL
    logits = jnp.dot(x_ref[...], wt_ref[...],
                     preferred_element_type=jnp.float32) + b_ref[...]  # [tb, A_pad] f32

    # Numerically stable log-softmax; exp computed exactly once per element.
    m = jnp.max(logits, axis=-1, keepdims=True)                  # [tb, 1]
    shifted = logits - m
    e = jnp.exp(shifted)                                         # padded lanes -> 0
    sumexp = jnp.sum(e, axis=-1, keepdims=True)                  # [tb, 1]
    log_z = jnp.log(sumexp)                                      # [tb, 1]
    logp = shifted - log_z                                       # log-softmax

    # Entropy via the lse form: H = logZ - (1/Z) * sum(e * shifted).
    # No probs slab, exact per-row divide (error confined to one scalar).
    s1 = jnp.sum(e * shifted, axis=-1, keepdims=True)            # [tb, 1]
    entropy = log_z - s1 / sumexp                                 # [tb, 1]

    # logsumexp of the raw logits; lets the caller reconstruct logits = logp+lse
    lse = m + log_z                                               # [tb, 1]

    # mode = first index attaining the row max (shifted == 0 exactly there);
    # padded lanes sit near -1e9 and can never win.
    lane = jax.lax.broadcasted_iota(jnp.int32, logits.shape, 1)
    mode = jnp.min(jnp.where(shifted == 0.0, lane, logits.shape[-1]),
                   axis=-1, keepdims=True).astype(jnp.float32)    # [tb, 1]
    # NOTE: mode rides through f32 -> exact for action counts < 2^24.

    # Pack the three per-row scalars into one lane-dense [tb, 128] slab:
    #   lane 0 = entropy, lane 1 = mode (f32), lane 2 = lse, rest = 0.
    out_lane = jax.lax.broadcasted_iota(jnp.int32, stats_ref.shape, 1)
    stats_ref[...] = jnp.where(out_lane == 0, entropy,
                               jnp.where(out_lane == 1, mode,
                                         jnp.where(out_lane == 2, lse, 0.0)))
    logp_ref[...] = logp


def _choose_block_b(B, D, A_pad, x_itemsize, *, vmem_budget_bytes=24 * 1024 * 1024):
    """Batch-tile selection, safe across v5e / v6e / v7x VMEM limits."""
    # dtype-native sublane tile: f32 -> 8 rows, bf16 -> 16, int8/fp8 -> 32.
    sub = {1: 32, 2: 16}.get(x_itemsize, 8)
    # Resident weight + bias, budgeted DOUBLE-buffered (Pallas may allocate two
    # buffers even for a constant index_map) -- important on v7x (64 MiB VMEM).
    fixed = 2 * (x_itemsize * D * A_pad + 4 * A_pad)
    if fixed > vmem_budget_bytes // 2:
        # TODO(synk): add a K/N-tiled fallback (grid over D or A) for huge heads.
        raise ValueError("resident weight too large for this scheme; tile over D/A")
    # Per batch row, double-buffered: x tile in, logp + stats slabs out (f32).
    per_row = 2 * (x_itemsize * D + 4 * A_pad + 4 * 128)
    cap_rows = max(sub, (vmem_budget_bytes - fixed) // max(per_row, 1))
    bb = int(min(1024, cap_rows))
    if B > 4 * sub:
        # >= 4 grid programs => >= 2 pipelined steps per v7x TensorCore, so
        # input prefetch / output writeback overlap compute on both cores.
        bb = min(bb, -(-B // 4))
    bb = max(sub, (bb // sub) * sub)        # dtype-native sublane alignment
    bb = min(bb, -(-B // sub) * sub)        # never (much) larger than the batch
    return bb


@functools.partial(jax.jit, static_argnames=("block_b",))
def categorical_net_forward_padded(x, wt_pad, bias_pad, *, block_b=None):
    """Fused CategoricalNet forward. Returns PADDED outputs (no slices inside jit).

    Args:
      x:        [B, D]      activations (f32 or bf16)
      wt_pad:   [D, A_pad]  pre-transposed, lane-padded weight (cached in __init__)
      bias_pad: [1, A_pad]  f32 bias, padded lanes = _NEG_FILL
    Returns:
      logp_pad [B, A_pad] f32  log-softmax (lanes >= A are junk; slice at consumer)
      stats    [B, 128]   f32  lane0=entropy, lane1=mode(f32), lane2=logsumexp
    """
    B, D = x.shape
    D2, A_pad = wt_pad.shape
    assert D == D2 and A_pad % 128 == 0

    x_isize = jnp.dtype(x.dtype).itemsize
    bb = _choose_block_b(B, D, A_pad, x_isize) if block_b is None else block_b
    grid = (pl.cdiv(B, bb),)

    cost = pl.CostEstimate(
        flops=2 * B * D * A_pad,
        transcendentals=B * (A_pad + 2),
        bytes_accessed=(x_isize * B * D
                        + jnp.dtype(wt_pad.dtype).itemsize * D * A_pad
                        + 4 * A_pad
                        + 4 * B * A_pad          # logp out
                        + 4 * B * 128),          # stats out
    )

    logp_pad, stats = pl.pallas_call(
        _categorical_net_kernel,
        out_shape=(jax.ShapeDtypeStruct((B, A_pad), jnp.float32),
                   jax.ShapeDtypeStruct((B, 128), jnp.float32)),
        grid_spec=pltpu.PrefetchScalarGridSpec(
            num_scalar_prefetch=0,
            grid=grid,
            in_specs=[
                pl.BlockSpec((bb, D), lambda i: (i, 0)),        # x batch tile
                pl.BlockSpec((D, A_pad), lambda i: (0, 0)),     # resident weight
                pl.BlockSpec((1, A_pad), lambda i: (0, 0)),     # resident bias
            ],
            out_specs=[
                pl.BlockSpec((bb, A_pad), lambda i: (i, 0)),    # log-softmax
                pl.BlockSpec((bb, 128), lambda i: (i, 0)),      # entropy/mode/lse
            ],
        ),
        compiler_params=pltpu.CompilerParams(
            dimension_semantics=("parallel",),
            vmem_limit_bytes=32 * 1024 * 1024),
        cost_estimate=cost,
    )(x, wt_pad, bias_pad)
    return logp_pad, stats


def _orthogonal_init(key, rows, cols, gain):
    """Matches torch.nn.init.orthogonal_ (handles rows < cols via transpose)."""
    transpose = rows < cols
    shape = (cols, rows) if transpose else (rows, cols)
    a = jax.random.normal(key, shape, dtype=jnp.float32)
    q, r = jnp.linalg.qr(a)
    q = q * jnp.sign(jnp.diagonal(r))
    if transpose:
        q = q.T
    return gain * q


class CategoricalNetJAX:
    """JAX/Pallas port of CategoricalNet: Linear + Categorical(logits=...)."""

    def __init__(self, num_inputs: int, num_outputs: int, key):
        D, A = num_inputs, num_outputs
        self.num_outputs = A
        self.weight = _orthogonal_init(key, A, D, gain=0.01)   # [A, D] (torch layout)
        self.bias = jnp.zeros((A,), dtype=jnp.float32)

        # Hoisted, cached kernel-layout params (not rebuilt per forward call):
        # lane-major [D, A_pad] weight and padded f32 bias (_NEG_FILL on pad lanes
        # so padded actions can never win the softmax/argmax).
        self.A_pad = max(128, -(-A // 128) * 128)
        self.wt_pad = jnp.pad(self.weight.T, ((0, 0), (0, self.A_pad - A)))
        self.bias_pad = jnp.pad(self.bias.astype(jnp.float32)[None, :],
                                ((0, 0), (0, self.A_pad - A)),
                                constant_values=_NEG_FILL)

    def __call__(self, x):
        A = self.num_outputs
        # Cast the cached weight to the activation dtype (no-op for f32; keeps
        # the native bf16 MXU path when activations are bf16).
        wt = self.wt_pad if self.wt_pad.dtype == x.dtype else self.wt_pad.astype(x.dtype)
        logp_pad, stats = categorical_net_forward_padded(x, wt, self.bias_pad)

        # Consumer-side views; the kernel never writes logits or probs to HBM.
        logp = logp_pad[:, :A]
        entropy = stats[:, 0:1]
        mode = stats[:, 1:2].astype(jnp.int32)
        lse = stats[:, 2:3]
        logits = logp + lse        # lazy reconstruction of the raw linear output
        probs = jnp.exp(logp)      # lazy softmax
        return {
            "logits": logits,      # raw linear output (distribution input)
            "log_probs": logp,     # log-softmax
            "probs": probs,        # softmax
            "mode": mode,          # argmax action, [B, 1] int32 (fused in-kernel)
            "entropy": entropy,    # [B, 1] (fused in-kernel)
        }
        # TODO(synk): dist.sample() needs a PRNG key; use
        # jax.random.categorical(key, logits)[..., None] at the call site.


if __name__ == "__main__":
    key = jax.random.PRNGKey(0)
    k_param, k_x = jax.random.split(key)

    batch, num_inputs, num_outputs = 8, 32, 8
    net = CategoricalNetJAX(num_inputs, num_outputs, k_param)
    x = jax.random.normal(k_x, (batch, num_inputs), dtype=jnp.float32)

    out = net(x)
    jax.block_until_ready(out)

    # Sanity checks against a plain-JAX reference.
    ref_logits = x @ net.weight.T + net.bias
    ref_logp = jax.nn.log_softmax(ref_logits, axis=-1)
    ref_probs = jax.nn.softmax(ref_logits, axis=-1)
    ref_entropy = -jnp.sum(ref_probs * ref_logp, axis=-1, keepdims=True)
    ref_mode = jnp.argmax(ref_probs, axis=-1, keepdims=True)

    assert jnp.allclose(out["logits"], ref_logits, atol=1e-4)
    assert jnp.allclose(out["log_probs"], ref_logp, atol=1e-5)
    assert jnp.allclose(jnp.sum(out["probs"], axis=-1), 1.0, atol=1e-5)
    assert jnp.allclose(out["entropy"], ref_entropy, atol=1e-4)
    assert jnp.array_equal(out["mode"], ref_mode.astype(out["mode"].dtype))

    print("KERNEL_OK")
</pallas_src>

<mosaic_0001>
module attributes {stable_mosaic.version = 11 : i64} {
  func.func @_categorical_net_kernel(%arg0: i32, %arg1: memref<8x32xf32, #tpu.memory_space<vmem>>, %arg2: memref<32x128xf32, #tpu.memory_space<vmem>>, %arg3: memref<1x128xf32, #tpu.memory_space<vmem>>, %arg4: memref<8x128xf32, #tpu.memory_space<vmem>>, %arg5: memref<8x128xf32, #tpu.memory_space<vmem>>) attributes {dimension_semantics = [#tpu.dimension_semantics<parallel>], iteration_bounds = array<i64: 1>, scalar_prefetch = 0 : i64, scratch_operands = 0 : i64, tpu.core_type = #tpu.core_type<tc>, window_params = [{transform_indices = @transform_0, window_bounds = array<i64: 8, 32>}, {pipeline_mode = #tpu.pipeline_mode<synchronous>, transform_indices = @transform_1, window_bounds = array<i64: 32, 128>}, {pipeline_mode = #tpu.pipeline_mode<synchronous>, transform_indices = @transform_2, window_bounds = array<i64: 1, 128>}, {transform_indices = @transform_3, window_bounds = array<i64: 8, 128>}, {transform_indices = @transform_4, window_bounds = array<i64: 8, 128>}]} {
    %c0 = arith.constant 0 : index
    %c0_0 = arith.constant 0 : index
    %0 = vector.load %arg1[%c0, %c0_0] : memref<8x32xf32, #tpu.memory_space<vmem>>, vector<8x32xf32>
    %c0_1 = arith.constant 0 : index
    %c0_2 = arith.constant 0 : index
    %1 = vector.load %arg2[%c0_1, %c0_2] : memref<32x128xf32, #tpu.memory_space<vmem>>, vector<32x128xf32>
    %cst = arith.constant dense<0.000000e+00> : vector<8x128xf32>
    %2 = tpu.matmul %0, %1, %cst {dimension_numbers = #tpu.dot_dimension_numbers<[1], [0], [0], [1], [0, 0, 1, 1], [], []>} : vector<8x32xf32>, vector<32x128xf32>, vector<8x128xf32> -> vector<8x128xf32>
    %c0_3 = arith.constant 0 : index
    %c0_4 = arith.constant 0 : index
    %3 = vector.load %arg3[%c0_3, %c0_4] : memref<1x128xf32, #tpu.memory_space<vmem>>, vector<1x128xf32>
    %4 = vector.broadcast %3 : vector<1x128xf32> to vector<8x128xf32>
    %5 = arith.addf %2, %4 : vector<8x128xf32>
    %cst_5 = arith.constant dense<0xFF800000> : vector<8xf32>
    %6 = vector.multi_reduction <maximumf>, %5, %cst_5 [1] : vector<8x128xf32> to vector<8xf32>
    %7 = vector.shape_cast %6 : vector<8xf32> to vector<8x1xf32>
    %8 = vector.broadcast %7 : vector<8x1xf32> to vector<8x128xf32>
    %9 = arith.subf %5, %8 : vector<8x128xf32>
    %10 = math.exp %9 : vector<8x128xf32>
    %cst_6 = arith.constant dense<0.000000e+00> : vector<8xf32>
    %11 = vector.multi_reduction <add>, %10, %cst_6 [1] : vector<8x128xf32> to vector<8xf32>
    %12 = vector.shape_cast %11 : vector<8xf32> to vector<8x1xf32>
    %13 = math.log %12 : vector<8x1xf32>
    %14 = vector.broadcast %13 : vector<8x1xf32> to vector<8x128xf32>
    %15 = arith.subf %9, %14 : vector<8x128xf32>
    %16 = arith.mulf %10, %9 : vector<8x128xf32>
    %cst_7 = arith.constant dense<0.000000e+00> : vector<8xf32>
    %17 = vector.multi_reduction <add>, %16, %cst_7 [1] : vector<8x128xf32> to vector<8xf32>
    %18 = vector.shape_cast %17 : vector<8xf32> to vector<8x1xf32>
    %19 = arith.divf %18, %12 : vector<8x1xf32>
    %20 = arith.subf %13, %19 : vector<8x1xf32>
    %21 = arith.addf %7, %13 : vector<8x1xf32>
    %22 = tpu.iota {dimensions = array<i32: 1>} : vector<8x128xi32>
    %cst_8 = arith.constant 0.000000e+00 : f32
    %23 = vector.broadcast %cst_8 : f32 to vector<8x128xf32>
    %24 = arith.cmpf oeq, %9, %23 : vector<8x128xf32>
    %c128_i32 = arith.constant 128 : i32
    %25 = vector.broadcast %c128_i32 : i32 to vector<8x128xi32>
    %26 = arith.select %24, %22, %25 : vector<8x128xi1>, vector<8x128xi32>
    %cst_9 = arith.constant dense<2147483647> : vector<8xi32>
    %27 = vector.multi_reduction <minsi>, %26, %cst_9 [1] : vector<8x128xi32> to vector<8xi32>
    %28 = vector.shape_cast %27 : vector<8xi32> to vector<8x1xi32>
    %29 = arith.sitofp %28 : vector<8x1xi32> to vector<8x1xf32>
    %30 = tpu.iota {dimensions = array<i32: 1>} : vector<8x128xi32>
    %c0_i32 = arith.constant 0 : i32
    %31 = vector.broadcast %c0_i32 : i32 to vector<8x128xi32>
    %32 = arith.cmpi eq, %30, %31 : vector<8x128xi32>
    %c1_i32 = arith.constant 1 : i32
    %33 = vector.broadcast %c1_i32 : i32 to vector<8x128xi32>
    %34 = arith.cmpi eq, %30, %33 : vector<8x128xi32>
    %c2_i32 = arith.constant 2 : i32
    %35 = vector.broadcast %c2_i32 : i32 to vector<8x128xi32>
    %36 = arith.cmpi eq, %30, %35 : vector<8x128xi32>
    %cst_10 = arith.constant 0.000000e+00 : f32
    %37 = vector.shape_cast %21 : vector<8x1xf32> to vector<8x1xf32>
    %38 = vector.broadcast %37 : vector<8x1xf32> to vector<8x128xf32>
    %39 = vector.broadcast %cst_10 : f32 to vector<8x128xf32>
    %40 = arith.select %36, %38, %39 : vector<8x128xi1>, vector<8x128xf32>
    %41 = vector.shape_cast %29 : vector<8x1xf32> to vector<8x1xf32>
    %42 = vector.broadcast %41 : vector<8x1xf32> to vector<8x128xf32>
    %43 = arith.select %34, %42, %40 : vector<8x128xi1>, vector<8x128xf32>
    %44 = vector.shape_cast %20 : vector<8x1xf32> to vector<8x1xf32>
    %45 = vector.broadcast %44 : vector<8x1xf32> to vector<8x128xf32>
    %46 = arith.select %32, %45, %43 : vector<8x128xi1>, vector<8x128xf32>
    %c0_11 = arith.constant 0 : index
    %c0_12 = arith.constant 0 : index
    %47 = vector.load %arg5[%c0_11, %c0_12] : memref<8x128xf32, #tpu.memory_space<vmem>>, vector<8x128xf32>
    tpu.vector_store %arg5[%c0_11, %c0_12], %46 {strides = array<i32>} : memref<8x128xf32, #tpu.memory_space<vmem>>, vector<8x128xf32>,
    %c0_13 = arith.constant 0 : index
    %c0_14 = arith.constant 0 : index
    %48 = vector.load %arg4[%c0_13, %c0_14] : memref<8x128xf32, #tpu.memory_space<vmem>>, vector<8x128xf32>
    tpu.vector_store %arg4[%c0_13, %c0_14], %15 {strides = array<i32>} : memref<8x128xf32, #tpu.memory_space<vmem>>, vector<8x128xf32>,
    return
  }
  func.func @transform_0(%arg0: i32) -> (i32, i32) {
    %c0_i32 = arith.constant 0 : i32
    %c0_i32_0 = arith.constant 0 : i32
    return %arg0, %c0_i32 : i32, i32
  }
  func.func @transform_1(%arg0: i32) -> (i32, i32) {
    %c0_i32 = arith.constant 0 : i32
    %c0_i32_0 = arith.constant 0 : i32
    %c0_i32_1 = arith.constant 0 : i32
    return %c0_i32, %c0_i32_0 : i32, i32
  }
  func.func @transform_2(%arg0: i32) -> (i32, i32) {
    %c0_i32 = arith.constant 0 : i32
    %c0_i32_0 = arith.constant 0 : i32
    %c0_i32_1 = arith.constant 0 : i32
    return %c0_i32, %c0_i32_0 : i32, i32
  }
  func.func @transform_3(%arg0: i32) -> (i32, i32) {
    %c0_i32 = arith.constant 0 : i32
    %c0_i32_0 = arith.constant 0 : i32
    return %arg0, %c0_i32 : i32, i32
  }
  func.func @transform_4(%arg0: i32) -> (i32, i32) {
    %c0_i32 = arith.constant 0 : i32
    %c0_i32_0 = arith.constant 0 : i32
    return %arg0, %c0_i32 : i32, i32
  }
}

</mosaic_0001>

<bundles_post_ra>
// kernel: categorical_net_forward_padded.1
= control target key start
LH: loop header
LB: loop body
LE: loop exit
PB: predicated region body
PF: predicated region fallthrough
CT: control target
= control target key end

     0   :  { %10 = vsyncpa [#allocation3], 0  ;;  %s342_s0 = inlined_call_operand.hbm [shape: f32[8,32], index: 0, kind: input, shape index: {}]   ;;  %s343_s1 = inlined_call_operand.hbm [shape: f32[32,128], index: 1, kind: input, shape index: {}]   ;;  %s344_s2 = inlined_call_operand.vmem [shape: f32[1,128], index: 2, kind: input, shape index: {}]   ;;  %s345_s3 = inlined_call_operand.hbm [shape: f32[8,128], index: 3, kind: output, shape index: {0}]   ;;  %s346_s4 = inlined_call_operand.hbm [shape: f32[8,128], index: 4, kind: output, shape index: {1}]  }
   0x1   :  { %11 = vsyncpa [#allocation6], 0 }
   0x2   :  { %12 = vsyncpa [#allocation4], 0 }
   0x3   :  { %13 = vsyncpa [#allocation9], 0  ;;  %s19_s17 = sshll.u32 %s342_s0, 4  ;;  %s290_s18 = smov [#allocation2]   ;;  %s20_s17 = int_to_ptr.hbm [resolvable:$true] %s19_s17 }
   0x4   :  { %s21_s19 = sshll.u32 %s290_s18, 4  ;;  %s29_s22 = sshll.u32 %s343_s1, 4  ;;  %s22_s19 = int_to_ptr.vmem [resolvable:$true] %s21_s19  ;;  %s30_s22 = int_to_ptr.hbm [resolvable:$true] %s29_s22 }
   0x5   :  { %24 = dma.hbm_to_vmem [thread:$0]  %s20_s17, 128, %s22_s19, [#allocation3]  }
   0x6   :  { %s291_s23 = smov [#allocation5]   ;;  %s292_s25 = smov 128  }
   0x7   :  { %s31_s24 = sshll.u32 %s291_s23, 4  ;;  %s293_s26 = smov 8   ;;  %s32_s24 = int_to_ptr.vmem [resolvable:$true] %s31_s24 }
   0x8   :  { %37 = dma.hbm_to_vmem [thread:$0]  %s30_s22, 512, %s32_s24, [#allocation6], %s292_s25, %s292_s25, %s293_s26  }
   0x9   :  { %282 = dma.done.wait [#allocation3], 128  }
   0xa   :  { %283 = vsyncadd [#allocation3], 4294967168 }
   0xb   :  { %284 = dma.done.wait [#allocation6], 512  }
   0xc   :  { %285 = vsyncadd [#allocation6], 4294966784  ;;  %v52_v0 = vld [vmem:[#allocation5 + $0x18] sm:$0xff]  ;;  %v51_v1 = vld [vmem:[#allocation5 + $0x10] sm:$0xff]  ;;  %vm57_vm0 = vcmask 261120   ;;  %v111_v8 = vlaneseq  ;;  %s145_s30 = sshll.u32 %s345_s3, 4  ;;  %s146_s30 = int_to_ptr.hbm [resolvable:$true] %s145_s30 }
   0xd   :  { %73 = vmatpush.msra.mxu0 %v52_v0  ;;  %v50_v2 = vld [vmem:[#allocation5 + $0x8] sm:$0xff]  ;;  %v49_v3 = vld [vmem:[#allocation5] sm:$0xff]  ;;  %v48_v4 = vld [vmem:[#allocation2] sm:$0xff]  ;;  %s295_s3 = smov [#allocation8]   ;;  %s156_s8 = sshll.u32 %s346_s4, 4  ;;  %s157_s8 = int_to_ptr.hbm [resolvable:$true] %s156_s8 }
   0xe   :  { %v179_v5 = vld [vmem:[%s344_s2] ss:$0 sm:$0xff]  ;;  %v330_v10 = vand.u32 127, %v111_v8  ;;  %s294_s2 = smov [#allocation7]   ;;  %s154_s5 = sshll.u32 %s295_s3, 4  ;;  %s155_s5 = int_to_ptr.vmem [resolvable:$true] %s154_s5 }
   0xf   :  { %74 = vmatpush.msra.mxu0 %v51_v1  ;;  %s143_s27 = sshll.u32 %s294_s2, 4  ;;  %s144_s27 = int_to_ptr.vmem [resolvable:$true] %s143_s27 }
  0x10   :  { %vm132_vm7 = vcmp.eq.s32.totalorder %v330_v10, 2  ;;  %vm131_vm8 = vcmp.eq.s32.totalorder %v330_v10, 1  ;;  %vm130_vm9 = vcmp.eq.s32.totalorder %v330_v10, 0 }
  0x11   :  { %75 = vmatpush.msra.mxu0 %v50_v2 }
  0x13   :  { %76 = vmatpush.msra.mxu0 %v49_v3 }
  0x14   :  { %172 = vmatmul.msk.f32.vlgmr.msra.gmra.mxu0 %vm57_vm0, %v48_v4 }
  0x91   :  { %v78_v6 = vpop.f32.mrf.mxu0 }
  0x92   :  { %v79_v7 = vadd.f32 %v179_v5, %v78_v6 }
  0x94   :  { %81 = vmax.xlane.f32.xlu0 %v79_v7 }
 0x107   :  { %v82_v9 = vpop.xlane.xlu0 %81 }
 0x108   :  { %v83_v11 = vsub.f32 %v79_v7, %v82_v9 }
 0x10a   :  { %vm113_vm1 = vcmp.eq.f32.partialorder %v83_v11, 0.0  ;;  %v84_v12 = vmul.f32 1.442695, %v83_v11 }
 0x10b   :  { %v114_v13 = vsel %vm113_vm1, %v330_v10, 128 }
 0x10c   :  { %v116_v14 = vshra.s32 %v114_v13, 16  ;;  %180 = vpow2.f32 %v84_v12  ;;  %v115_v18 = vand.u32 65535, %v114_v13 }
 0x10e   :  { %v118_v15 = vcvt.s32.f32 %v116_v14  ;;  %v117_v20 = vcvt.s32.f32 %v115_v18 }
 0x110   :  { %119 = vmin.xlane.f32.xlu0 %v118_v15 }
 0x112   :  { %v181_v16 = vpop.eup %180 }
 0x113   :  { %86 = vadd.xlane.f32.xlu1 %v181_v16  ;;  %v91_v17 = vmul.f32 %v181_v16, %v83_v11 }
 0x115   :  { %92 = vadd.xlane.f32.xlu2 %v91_v17 }
 0x183   :  { %v120_v19 = vpop.xlane.xlu0 %119 }
 0x184   :  { %vm121_vm2 = vcmp.eq.f32.partialorder %v118_v15, %v120_v19  ;;  %v126_v34 = vcvt.f32.s32 %v120_v19 }
 0x185   :  { %v122_v21 = vsel %vm121_vm2, %v117_v20, inf }
 0x186   :  { %123 = vmin.xlane.f32.xlu1 %v122_v21  ;;  %v87_v22 = vpop.xlane.xlu1 %86  ;;  %v127_v38 = vshll.u32 %v126_v34, 16 }
 0x187   :  { %182 = vlog2.f32 %v87_v22  ;;  %v105_v31 = vand.u32 2147483648, %v87_v22  ;;  %vm99_vm4 = vweird.f32 %v87_v22  ;;  %v103_v32 = vand.u32 2147483647, %v87_v22 }
 0x188   :  { %184 = vrcp.f32 %v87_v22  ;;  %v93_v39 = vpop.xlane.xlu2 %92 }
 0x189   :  { %v106_v35 = vor.u32 1.1754944e-38, %v105_v31  ;;  %vm104_vm6 = vcmp.eq.f32.partialorder %v103_v32, 8.507059e+37 }
 0x18d   :  { %v183_v23 = vpop.eup %182 }
 0x18e   :  { %v89_v24 = vmul.f32 0.6931472, %v183_v23  ;;  %v185_v26 = vpop.eup %184 }
 0x18f   :  { %v95_v27 = vmul.f32 %v185_v26, %v87_v22  ;;  %vm100_vm3 = vweird.f32 %v185_v26 }
 0x190   :  { %v90_v25 = vsub.f32 %v83_v11, %v89_v24  ;;  %vm101_vm5 = vmor %vm99_vm4, %vm100_vm3  ;;  %v110_v42 = vadd.f32 %v89_v24, %v82_v9 }
 0x191   :  { %v96_v28 = vsub.f32 1.0, %v95_v27 }
 0x192   :  { %137 = vst [vmem:[#allocation7] sm:$0xff] %v90_v25  ;;  %v133_v46 = vsel %vm132_vm7, %v110_v42, 0.0 }
 0x193   :  { %148 = dma.vmem_to_hbm [thread:$0]  %s144_s27, 128, %s146_s30, [#allocation4]   ;;  %v97_v29 = vmul.f32 %v185_v26, %v96_v28 }
 0x195   :  { %v98_v30 = vadd.f32 %v185_v26, %v97_v29 }
 0x197   :  { %v102_v33 = vsel %vm101_vm5, %v185_v26, %v98_v30 }
 0x198   :  { %v107_v36 = vsel %vm104_vm6, %v106_v35, %v102_v33 }
 0x199   :  { %v108_v41 = vmul.f32 %v107_v36, %v93_v39 }
 0x19b   :  { %v109_v45 = vsub.f32 %v89_v24, %v108_v41 }
 0x1f9   :  { %v124_v37 = vpop.xlane.xlu1 %123 }
 0x1fa   :  { %v125_v40 = vcvt.f32.s32 %v124_v37 }
 0x1fc   :  { %v128_v43 = vadd.s32 %v127_v38, %v125_v40 }
 0x1fe   :  { %v129_v44 = vcvt.s32.f32 %v128_v43 }
 0x200   :  { %v134_v47 = vsel %vm131_vm8, %v129_v44, %v133_v46 }
 0x201   :  { %v135_v48 = vsel %vm130_vm9, %v109_v45, %v134_v47 }
 0x202   :  { %136 = vst [vmem:[#allocation8] sm:$0xff] %v135_v48 }
 0x203   :  { %159 = dma.vmem_to_hbm [thread:$0]  %s155_s5, 128, %s157_s8, [#allocation9]  }
 0x204   :  { %286 = dma.done.wait [#allocation4], 128  }
 0x205   :  { %287 = vsyncadd [#allocation4], 4294967168 }
 0x206   :  { %288 = dma.done.wait [#allocation9], 128  }
 0x207   :  { %289 = vsyncadd [#allocation9], 4294967168 }
 0x208   :  { %168 = vsyncpa [#allocation3], 1 }
 0x209   :  { %169 = vsyncpa [#allocation6], 1 }
 0x20a   :  { %170 = vsyncpa [#allocation4], 1 }
 0x20b   :  { %171 = vsyncpa [#allocation9], 1 }

</bundles_post_ra>
